<compile_context>
chip_gen: v7x
topology: tpu7x:2x2x1
jax: 0.10.0
libtpu: 0.0.40
codegen_flags: <defaults>
</compile_context>

<pallas_src>
import jax
import jax.numpy as jnp
from jax import lax
from jax.experimental import pallas as pl
from jax.experimental.pallas import tpu as pltpu

# ----- config (small, consistent with the module's forward) -----
N = 2          # batch
L = 16         # sequence length
E = 32         # config.embedding_dim
F = 32         # config.num_filters
K = 3          # config.filter_width (odd -> torch pad = floor(K/2) keeps length)
NL = 8         # config.num_labels
NUM_ATTN = 2   # num_attn
VOCAB = 50
PAD = K // 2

KV = K * VOCAB                      # 150: fused (tap, vocab) rows
KVP = ((KV + 7) // 8) * 8           # 152: 8-row aligned table region / pad sentinel id
CB_OFF = KVP                        # conv bias block (8 rows)
AW_OFF = CB_OFF + 8                 # attention weights (NUM_ATTN*NL rows)
FW_OFF = AW_OFF + NUM_ATTN * NL     # fc2.weight^T (F rows)
FB_OFF = FW_OFF + F                 # fc2 bias block (8 rows)
HS_OFF = FB_OFF + 8                 # head-sum 0/1 matrix (NUM_ATTN*NL rows)
SLAB_ROWS = HS_OFF + NUM_ATTN * NL  # 232 total rows, 32 lanes


def caml_kernel(gid_ref, slab_ref, yhat_ref, alpha_ref):
    """Whole batch in one program.

    gid:  (N*L, K) int32  per-tap fused gather ids (k*VOCAB + token; KVP = pad/invalid)
    slab: (SLAB_ROWS, F) f32  packed weights (see offsets above)
    outputs: y_hat (N, NL) f32,  alpha (N, NUM_ATTN*NL, L) f32
    """
    # ---- static, 8-row-aligned slab views (free) ----
    table_bf = slab_ref[0:KVP, :].astype(jnp.bfloat16)                     # (KVP, F)
    conv_b = slab_ref[CB_OFF:CB_OFF + 1, :]                                # (1, F)  f32
    attnw_bf = slab_ref[AW_OFF:AW_OFF + NUM_ATTN * NL, :].astype(jnp.bfloat16)
    fc2wt = slab_ref[FW_OFF:FW_OFF + F, 0:NUM_ATTN * NL]                   # (F, A*NL) f32
    fc2b = slab_ref[FB_OFF:FB_OFF + 1, 0:NL]                               # (1, NL) f32
    head_sum_bf = slab_ref[HS_OFF:HS_OFF + NUM_ATTN * NL, 0:NL].astype(jnp.bfloat16)
    ones_f_bf = jnp.ones((1, F), jnp.bfloat16)

    # ---- 1. fused embedding gather + conv1d("same") + bias + tanh: ONE MXU matmul ----
    gid = gid_ref[...]                                                     # (N*L, K)
    lane = lax.broadcasted_iota(jnp.int32, (N * L, KVP), 1)
    onehot = jnp.zeros((N * L, KVP), jnp.bfloat16)
    for k in range(K):                                                     # static, K=3
        onehot = onehot + (gid[:, k:k + 1] == lane).astype(jnp.bfloat16)   # exact 0/1
    H = jnp.dot(onehot, table_bf, preferred_element_type=jnp.float32)      # (N*L, F)
    H = jnp.tanh(H + conv_b)                                               # f32 elementwise
    H_bf = H.astype(jnp.bfloat16)

    yh_rows = []
    for n in range(N):                                                     # static, N=2
        Hn_bf = H_bf[n * L:(n + 1) * L, :]                                 # (L, F) aligned

        # ---- 2. batched-head label attention ----
        # scores[i, l] = sum_f attnw[i, f] * Hn[l, f]   -> (A*NL, L)
        s = lax.dot_general(attnw_bf, Hn_bf, (((1,), (1,)), ((), ())),
                            preferred_element_type=jnp.float32)
        s = s - jnp.max(s, axis=-1, keepdims=True)                         # softmax over L
        p = jnp.exp(s)
        al = p * pl.reciprocal(jnp.sum(p, axis=-1, keepdims=True), approx=True)
        alpha_ref[n] = al                                                  # no reshape/pack

        # context (transposed): vt[f, a*NL+j] = sum_l Hn[l, f] * al[a*NL+j, l]
        vt = lax.dot_general(Hn_bf, al.astype(jnp.bfloat16), (((0,), (1,)), ((), ())),
                             preferred_element_type=jnp.float32)           # (F, A*NL)

        # ---- 3. z = sum(fc2.weight * V, dim=2) + fc2.bias ; y_hat = sigmoid(z) ----
        P = (fc2wt * vt).astype(jnp.bfloat16)                              # (F, A*NL)
        ph = jnp.dot(P, head_sum_bf, preferred_element_type=jnp.float32)   # (F, NL): sum heads
        z = jnp.dot(ones_f_bf, ph.astype(jnp.bfloat16),
                    preferred_element_type=jnp.float32) + fc2b             # (1, NL): sum F
        yh_rows.append(jax.nn.sigmoid(z))                                  # f32 elementwise

    yhat_ref[...] = jnp.concatenate(yh_rows, axis=0)                       # one (N, NL) store


def init_params(key):
    ks = jax.random.split(key, 6)

    def xavier(k, shape, fan_in, fan_out):
        bound = (6.0 / (fan_in + fan_out)) ** 0.5
        return jax.random.uniform(k, shape, jnp.float32, -bound, bound)

    embed = jax.random.normal(ks[0], (VOCAB, E), jnp.float32) * 0.1
    # TODO(synk): checkpoint loading must permute torch conv weight (F,E,K) -> (K,E,F).
    conv_w = xavier(ks[1], (K, E, F), E * K, F)
    conv_b = jnp.zeros((1, F), jnp.float32)
    attn_w = xavier(ks[2], (NUM_ATTN, NL, F), F, NL)               # multiattn[i].weight
    fc2_w = xavier(ks[3], (NL, NUM_ATTN * F), NUM_ATTN * F, NL)    # torch fc2.weight layout
    fc2_b = jnp.zeros((1, NL), jnp.float32)
    return dict(embed=embed, conv_w=conv_w, conv_b=conv_b,
                attn_w=attn_w, fc2_w=fc2_w, fc2_b=fc2_b)


def caml_forward(params, x_tokens, y):
    # TODO(synk): nn.Dropout in train mode not reproduced (treated as identity / eval).
    # ---- trace-time weight fusion: per-tap embed @ conv_w -> one gather+conv table ----
    table = jnp.einsum('ve,kef->kvf', params['embed'], params['conv_w'],
                       precision=lax.Precision.HIGHEST).reshape(KV, F)
    table = jnp.pad(table, ((0, KVP - KV), (0, 0)))                        # (KVP, F)

    attnw_all = params['attn_w'].reshape(NUM_ATTN * NL, F)
    # fc2.weight (NL, NUM_ATTN*F) -> (F, NUM_ATTN*NL): [f, a*NL+j] = w[j, a*F+f]
    fc2w_t = (params['fc2_w'].reshape(NL, NUM_ATTN, F)
              .transpose(2, 1, 0).reshape(F, NUM_ATTN * NL))
    head_sum = jnp.tile(jnp.eye(NL, dtype=jnp.float32), (NUM_ATTN, 1))     # (A*NL, NL)

    def pad_block(a, rows):
        return jnp.pad(a, ((0, rows - a.shape[0]), (0, F - a.shape[1])))

    slab = jnp.concatenate([
        table,                                    # rows [0, KVP)
        pad_block(params['conv_b'], 8),           # rows [CB_OFF, +8)
        pad_block(attnw_all, NUM_ATTN * NL),      # rows [AW_OFF, +A*NL)
        pad_block(fc2w_t, F),                     # rows [FW_OFF, +F)
        pad_block(params['fc2_b'], 8),            # rows [FB_OFF, +8)
        pad_block(head_sum, NUM_ATTN * NL),       # rows [HS_OFF, +A*NL)
    ], axis=0)                                    # (SLAB_ROWS, F) — single input DMA

    # token-space "same" padding + per-tap fused gather ids (tiny int ops only).
    # Note: ids outside [0, VOCAB) silently map to the zero row (same as padding).
    tok_pad = jnp.pad(x_tokens.astype(jnp.int32), ((0, 0), (PAD, PAD)),
                      constant_values=-1)
    taps = jnp.stack([tok_pad[:, k:k + L] for k in range(K)], axis=-1)     # (N, L, K)
    offs = jnp.arange(K, dtype=jnp.int32) * VOCAB
    valid = (taps >= 0) & (taps < VOCAB)
    gid = jnp.where(valid, taps + offs, KVP).reshape(N * L, K).astype(jnp.int32)

    vmem = pl.BlockSpec(memory_space=pltpu.MemorySpace.VMEM)
    yhat, alpha_pack = pl.pallas_call(
        caml_kernel,
        out_shape=(jax.ShapeDtypeStruct((N, NL), jnp.float32),             # y_hat
                   jax.ShapeDtypeStruct((N, NUM_ATTN * NL, L), jnp.float32)),  # alpha
        in_specs=[vmem, vmem],
        out_specs=(vmem, vmem),
    )(gid, slab)

    # ---- binary cross entropy (mean reduction, torch-style -100 log clamp) in wrapper ----
    logp = jnp.maximum(jnp.log(yhat), -100.0)
    log1mp = jnp.maximum(jnp.log(1.0 - yhat), -100.0)
    loss = jnp.mean(-(y * logp + (1.0 - y) * log1mp))

    # restore the PyTorch-facing alpha layout: (NUM_ATTN, N, NL, L)
    alpha = alpha_pack.reshape(N, NUM_ATTN, NL, L).transpose(1, 0, 2, 3)
    return yhat, loss, alpha


if __name__ == "__main__":
    key = jax.random.PRNGKey(0)
    kp, kx, ky = jax.random.split(key, 3)
    params = init_params(kp)
    x_tokens = jax.random.randint(kx, (N, L), 0, VOCAB)             # token ids
    y = jax.random.bernoulli(ky, 0.3, (N, NL)).astype(jnp.float32)  # multilabel targets

    y_hat, loss, alpha = jax.jit(caml_forward)(params, x_tokens, y)
    jax.block_until_ready((y_hat, loss, alpha))

    assert y_hat.shape == (N, NL)
    assert loss.shape == ()
    assert alpha.shape == (NUM_ATTN, N, NL, L)
    print("KERNEL_OK")
</pallas_src>

<mosaic_0001>
module attributes {stable_mosaic.version = 11 : i64} {
  func.func @caml_kernel(%arg0: memref<32x3xi32, #tpu.memory_space<vmem>>, %arg1: memref<232x32xf32, #tpu.memory_space<vmem>>, %arg2: memref<2x8xf32, #tpu.memory_space<vmem>>, %arg3: memref<2x16x16xf32, #tpu.memory_space<vmem>>) attributes {dimension_semantics = [], scalar_prefetch = 0 : i64, scratch_operands = 0 : i64, tpu.core_type = #tpu.core_type<tc>} {
    %c0 = arith.constant 0 : index
    %c0_0 = arith.constant 0 : index
    %0 = vector.load %arg1[%c0, %c0_0] : memref<232x32xf32, #tpu.memory_space<vmem>>, vector<152x32xf32>
    %1 = arith.truncf %0 : vector<152x32xf32> to vector<152x32xbf16>
    %c152 = arith.constant 152 : index
    %c0_1 = arith.constant 0 : index
    %2 = vector.load %arg1[%c152, %c0_1] : memref<232x32xf32, #tpu.memory_space<vmem>>, vector<1x32xf32>
    %c160 = arith.constant 160 : index
    %c0_2 = arith.constant 0 : index
    %3 = vector.load %arg1[%c160, %c0_2] : memref<232x32xf32, #tpu.memory_space<vmem>>, vector<16x32xf32>
    %4 = arith.truncf %3 : vector<16x32xf32> to vector<16x32xbf16>
    %c176 = arith.constant 176 : index
    %c0_3 = arith.constant 0 : index
    %5 = vector.load %arg1[%c176, %c0_3] : memref<232x32xf32, #tpu.memory_space<vmem>>, vector<32x16xf32>
    %c208 = arith.constant 208 : index
    %c0_4 = arith.constant 0 : index
    %6 = vector.load %arg1[%c208, %c0_4] : memref<232x32xf32, #tpu.memory_space<vmem>>, vector<1x8xf32>
    %c216 = arith.constant 216 : index
    %c0_5 = arith.constant 0 : index
    %7 = vector.load %arg1[%c216, %c0_5] : memref<232x32xf32, #tpu.memory_space<vmem>>, vector<16x8xf32>
    %8 = arith.truncf %7 : vector<16x8xf32> to vector<16x8xbf16>
    %cst = arith.constant 1.000000e+00 : bf16
    %9 = vector.broadcast %cst : bf16 to vector<1x32xbf16>
    %c0_6 = arith.constant 0 : index
    %c0_7 = arith.constant 0 : index
    %10 = vector.load %arg0[%c0_6, %c0_7] : memref<32x3xi32, #tpu.memory_space<vmem>>, vector<32x3xi32>
    %11 = tpu.iota {dimensions = array<i32: 1>} : vector<32x152xi32>
    %cst_8 = arith.constant 0.000000e+00 : bf16
    %12 = vector.broadcast %cst_8 : bf16 to vector<32x152xbf16>
    %13 = vector.extract_strided_slice %10 {offsets = [0, 0], sizes = [32, 1], strides = [1, 1]} : vector<32x3xi32> to vector<32x1xi32>
    %14 = vector.broadcast %13 : vector<32x1xi32> to vector<32x152xi32>
    %15 = arith.cmpi eq, %14, %11 : vector<32x152xi32>
    %16 = arith.extui %15 : vector<32x152xi1> to vector<32x152xi32>
    %17 = arith.sitofp %16 : vector<32x152xi32> to vector<32x152xf32>
    %18 = arith.truncf %17 : vector<32x152xf32> to vector<32x152xbf16>
    %19 = arith.addf %12, %18 : vector<32x152xbf16>
    %20 = vector.extract_strided_slice %10 {offsets = [0, 1], sizes = [32, 1], strides = [1, 1]} : vector<32x3xi32> to vector<32x1xi32>
    %21 = vector.broadcast %20 : vector<32x1xi32> to vector<32x152xi32>
    %22 = arith.cmpi eq, %21, %11 : vector<32x152xi32>
    %23 = arith.extui %22 : vector<32x152xi1> to vector<32x152xi32>
    %24 = arith.sitofp %23 : vector<32x152xi32> to vector<32x152xf32>
    %25 = arith.truncf %24 : vector<32x152xf32> to vector<32x152xbf16>
    %26 = arith.addf %19, %25 : vector<32x152xbf16>
    %27 = vector.extract_strided_slice %10 {offsets = [0, 2], sizes = [32, 1], strides = [1, 1]} : vector<32x3xi32> to vector<32x1xi32>
    %28 = vector.broadcast %27 : vector<32x1xi32> to vector<32x152xi32>
    %29 = arith.cmpi eq, %28, %11 : vector<32x152xi32>
    %30 = arith.extui %29 : vector<32x152xi1> to vector<32x152xi32>
    %31 = arith.sitofp %30 : vector<32x152xi32> to vector<32x152xf32>
    %32 = arith.truncf %31 : vector<32x152xf32> to vector<32x152xbf16>
    %33 = arith.addf %26, %32 : vector<32x152xbf16>
    %cst_9 = arith.constant dense<0.000000e+00> : vector<32x32xf32>
    %34 = tpu.matmul %33, %1, %cst_9 {dimension_numbers = #tpu.dot_dimension_numbers<[1], [0], [0], [1], [0, 0, 1, 1], [], []>} : vector<32x152xbf16>, vector<152x32xbf16>, vector<32x32xf32> -> vector<32x32xf32>
    %35 = vector.broadcast %2 : vector<1x32xf32> to vector<32x32xf32>
    %36 = arith.addf %34, %35 : vector<32x32xf32>
    %37 = math.tanh %36 : vector<32x32xf32>
    %38 = arith.truncf %37 : vector<32x32xf32> to vector<32x32xbf16>
    %39 = vector.extract_strided_slice %38 {offsets = [0, 0], sizes = [16, 32], strides = [1, 1]} : vector<32x32xbf16> to vector<16x32xbf16>
    %cst_10 = arith.constant dense<0.000000e+00> : vector<16x16xf32>
    %40 = tpu.matmul %4, %39, %cst_10 {dimension_numbers = #tpu.dot_dimension_numbers<[1], [1], [0], [0], [0, 0, 1, 0], [], []>} : vector<16x32xbf16>, vector<16x32xbf16>, vector<16x16xf32> -> vector<16x16xf32>
    %cst_11 = arith.constant dense<0xFF800000> : vector<16xf32>
    %41 = vector.multi_reduction <maximumf>, %40, %cst_11 [1] : vector<16x16xf32> to vector<16xf32>
    %42 = vector.shape_cast %41 : vector<16xf32> to vector<16x1xf32>
    %43 = vector.broadcast %42 : vector<16x1xf32> to vector<16x16xf32>
    %44 = arith.subf %40, %43 : vector<16x16xf32>
    %45 = math.exp %44 : vector<16x16xf32>
    %cst_12 = arith.constant dense<0.000000e+00> : vector<16xf32>
    %46 = vector.multi_reduction <add>, %45, %cst_12 [1] : vector<16x16xf32> to vector<16xf32>
    %47 = vector.shape_cast %46 : vector<16xf32> to vector<16x1xf32>
    %48 = tpu.reciprocal %47 {approx = true} : vector<16x1xf32> -> vector<16x1xf32>
    %49 = vector.broadcast %48 : vector<16x1xf32> to vector<16x16xf32>
    %50 = arith.mulf %45, %49 : vector<16x16xf32>
    %c0_13 = arith.constant 0 : index
    %c0_14 = arith.constant 0 : index
    %c0_15 = arith.constant 0 : index
    %51 = vector.load %arg3[%c0_13, %c0_14, %c0_15] : memref<2x16x16xf32, #tpu.memory_space<vmem>>, vector<1x16x16xf32>
    %52 = vector.shape_cast %51 : vector<1x16x16xf32> to vector<16x16xf32>
    %53 = vector.shape_cast %50 : vector<16x16xf32> to vector<1x16x16xf32>
    tpu.vector_store %arg3[%c0_13, %c0_14, %c0_15], %53 {strides = array<i32>} : memref<2x16x16xf32, #tpu.memory_space<vmem>>, vector<1x16x16xf32>,
    %54 = arith.truncf %50 : vector<16x16xf32> to vector<16x16xbf16>
    %cst_16 = arith.constant dense<0.000000e+00> : vector<32x16xf32>
    %55 = tpu.matmul %39, %54, %cst_16 {dimension_numbers = #tpu.dot_dimension_numbers<[0], [1], [1], [0], [0, 1, 1, 0], [], []>} : vector<16x32xbf16>, vector<16x16xbf16>, vector<32x16xf32> -> vector<32x16xf32>
    %56 = arith.mulf %5, %55 : vector<32x16xf32>
    %57 = arith.truncf %56 : vector<32x16xf32> to vector<32x16xbf16>
    %cst_17 = arith.constant dense<0.000000e+00> : vector<32x8xf32>
    %58 = tpu.matmul %57, %8, %cst_17 {dimension_numbers = #tpu.dot_dimension_numbers<[1], [0], [0], [1], [0, 0, 1, 1], [], []>} : vector<32x16xbf16>, vector<16x8xbf16>, vector<32x8xf32> -> vector<32x8xf32>
    %59 = arith.truncf %58 : vector<32x8xf32> to vector<32x8xbf16>
    %cst_18 = arith.constant dense<0.000000e+00> : vector<1x8xf32>
    %60 = tpu.matmul %9, %59, %cst_18 {dimension_numbers = #tpu.dot_dimension_numbers<[1], [0], [0], [1], [0, 0, 1, 1], [], []>} : vector<1x32xbf16>, vector<32x8xbf16>, vector<1x8xf32> -> vector<1x8xf32>
    %61 = arith.addf %60, %6 : vector<1x8xf32>
    %62 = arith.negf %61 : vector<1x8xf32>
    %63 = math.exp %62 : vector<1x8xf32>
    %cst_19 = arith.constant 1.000000e+00 : f32
    %64 = vector.broadcast %cst_19 : f32 to vector<1x8xf32>
    %65 = arith.addf %64, %63 : vector<1x8xf32>
    %66 = arith.divf %64, %65 : vector<1x8xf32>
    %67 = vector.extract_strided_slice %38 {offsets = [16, 0], sizes = [16, 32], strides = [1, 1]} : vector<32x32xbf16> to vector<16x32xbf16>
    %cst_20 = arith.constant dense<0.000000e+00> : vector<16x16xf32>
    %68 = tpu.matmul %4, %67, %cst_20 {dimension_numbers = #tpu.dot_dimension_numbers<[1], [1], [0], [0], [0, 0, 1, 0], [], []>} : vector<16x32xbf16>, vector<16x32xbf16>, vector<16x16xf32> -> vector<16x16xf32>
    %cst_21 = arith.constant dense<0xFF800000> : vector<16xf32>
    %69 = vector.multi_reduction <maximumf>, %68, %cst_21 [1] : vector<16x16xf32> to vector<16xf32>
    %70 = vector.shape_cast %69 : vector<16xf32> to vector<16x1xf32>
    %71 = vector.broadcast %70 : vector<16x1xf32> to vector<16x16xf32>
    %72 = arith.subf %68, %71 : vector<16x16xf32>
    %73 = math.exp %72 : vector<16x16xf32>
    %cst_22 = arith.constant dense<0.000000e+00> : vector<16xf32>
    %74 = vector.multi_reduction <add>, %73, %cst_22 [1] : vector<16x16xf32> to vector<16xf32>
    %75 = vector.shape_cast %74 : vector<16xf32> to vector<16x1xf32>
    %76 = tpu.reciprocal %75 {approx = true} : vector<16x1xf32> -> vector<16x1xf32>
    %77 = vector.broadcast %76 : vector<16x1xf32> to vector<16x16xf32>
    %78 = arith.mulf %73, %77 : vector<16x16xf32>
    %c1 = arith.constant 1 : index
    %c0_23 = arith.constant 0 : index
    %c0_24 = arith.constant 0 : index
    %79 = vector.load %arg3[%c1, %c0_23, %c0_24] : memref<2x16x16xf32, #tpu.memory_space<vmem>>, vector<1x16x16xf32>
    %80 = vector.shape_cast %79 : vector<1x16x16xf32> to vector<16x16xf32>
    %81 = vector.shape_cast %78 : vector<16x16xf32> to vector<1x16x16xf32>
    tpu.vector_store %arg3[%c1, %c0_23, %c0_24], %81 {strides = array<i32>} : memref<2x16x16xf32, #tpu.memory_space<vmem>>, vector<1x16x16xf32>,
    %82 = arith.truncf %78 : vector<16x16xf32> to vector<16x16xbf16>
    %cst_25 = arith.constant dense<0.000000e+00> : vector<32x16xf32>
    %83 = tpu.matmul %67, %82, %cst_25 {dimension_numbers = #tpu.dot_dimension_numbers<[0], [1], [1], [0], [0, 1, 1, 0], [], []>} : vector<16x32xbf16>, vector<16x16xbf16>, vector<32x16xf32> -> vector<32x16xf32>
    %84 = arith.mulf %5, %83 : vector<32x16xf32>
    %85 = arith.truncf %84 : vector<32x16xf32> to vector<32x16xbf16>
    %cst_26 = arith.constant dense<0.000000e+00> : vector<32x8xf32>
    %86 = tpu.matmul %85, %8, %cst_26 {dimension_numbers = #tpu.dot_dimension_numbers<[1], [0], [0], [1], [0, 0, 1, 1], [], []>} : vector<32x16xbf16>, vector<16x8xbf16>, vector<32x8xf32> -> vector<32x8xf32>
    %87 = arith.truncf %86 : vector<32x8xf32> to vector<32x8xbf16>
    %cst_27 = arith.constant dense<0.000000e+00> : vector<1x8xf32>
    %88 = tpu.matmul %9, %87, %cst_27 {dimension_numbers = #tpu.dot_dimension_numbers<[1], [0], [0], [1], [0, 0, 1, 1], [], []>} : vector<1x32xbf16>, vector<32x8xbf16>, vector<1x8xf32> -> vector<1x8xf32>
    %89 = arith.addf %88, %6 : vector<1x8xf32>
    %90 = arith.negf %89 : vector<1x8xf32>
    %91 = math.exp %90 : vector<1x8xf32>
    %cst_28 = arith.constant 1.000000e+00 : f32
    %92 = vector.broadcast %cst_28 : f32 to vector<1x8xf32>
    %93 = arith.addf %92, %91 : vector<1x8xf32>
    %94 = arith.divf %92, %93 : vector<1x8xf32>
    %95 = tpu.concatenate %66, %94 in 0 : vector<1x8xf32>, vector<1x8xf32> -> vector<2x8xf32>
    %c0_29 = arith.constant 0 : index
    %c0_30 = arith.constant 0 : index
    %96 = vector.load %arg2[%c0_29, %c0_30] : memref<2x8xf32, #tpu.memory_space<vmem>>, vector<2x8xf32>
    tpu.vector_store %arg2[%c0_29, %c0_30], %95 {strides = array<i32>} : memref<2x8xf32, #tpu.memory_space<vmem>>, vector<2x8xf32>,
    return
  }
}

</mosaic_0001>

<bundles_post_ra>
// kernel: caml_forward.1
= control target key start
LH: loop header
LB: loop body
LE: loop exit
PB: predicated region body
PF: predicated region fallthrough
CT: control target
= control target key end

     0   :  { %v957_v0 = vmov 1   ;;  %v958_v1 = vmov 0   ;;  %v959_v9 = vmov 0.0   ;;  %v960_v14 = vmov 2   ;;  %s1248_s0 = inlined_call_operand.vmem [shape: s32[32,3], index: 0, kind: input, shape index: {}]   ;;  %s1249_s1 = inlined_call_operand.vmem [shape: f32[232,32], index: 1, kind: input, shape index: {}]   ;;  %s1250_s3 = inlined_call_operand.vmem [shape: f32[2,16,16], index: 3, kind: output, shape index: {1}]   ;;  %s1251_s2 = inlined_call_operand.vmem [shape: f32[2,8], index: 2, kind: output, shape index: {0}]  }
   0x1   :  { %919 = vset.pattern.permute.xlu1 %v957_v0  ;;  %918 = vset.pattern.permute.xlu0 %v958_v1  ;;  %v56_v2 = vld [vmem:[%s1248_s0] sm:$0xff]  ;;  %v16_v4 = vld [vmem:[%s1249_s1 + $0x8] sm:$0xff]  ;;  %v17_v5 = vld [vmem:[%s1249_s1 + $0x10] sm:$0xff]  ;;  %vm206_vm0 = vcmask 1043456   ;;  %v60_v36 = vlaneseq  ;;  %vm199_vm13 = vcmask 195584   ;;  %vm961_vm14 = vmmov 0  }
   0x2   :  { %v15_v3 = vld [vmem:[%s1249_s1] sm:$0xff]  ;;  %108 = vperm.xlu1 %919, %v56_v2   ;;  %64 = vperm.xlu0 %918, %v56_v2   ;;  %v18_v6 = vld [vmem:[%s1249_s1 + $0x18] sm:$0xff]  ;;  %v57_v7 = vld [vmem:[%s1248_s0 + $0x8] sm:$0xff]  ;;  %vm265_vm15 = vcmask 261120  }
   0x3   :  { %210 = vmatprep.subr.bf16.mxu0 %v958_v1  ;;  %v34_v8 = vpack.c.bf16 %v16_v4, %v15_v3  ;;  %858 = vmatprep.subr.bf16.mxu1 %v959_v9  ;;  %v35_v10 = vpack.c.bf16 %v18_v6, %v17_v5  ;;  %v19_v11 = vld [vmem:[%s1249_s1 + $0x20] sm:$0xff]  ;;  %v20_v12 = vld [vmem:[%s1249_s1 + $0x28] sm:$0xff]  ;;  %v21_v15 = vld [vmem:[%s1249_s1 + $0x30] sm:$0xff]  ;;  %v1062_v37 = vand.u32 127, %v60_v36 }
   0x4   :  { %v36_v13 = vpack.c.bf16 %v20_v12, %v19_v11  ;;  %v22_v16 = vld [vmem:[%s1249_s1 + $0x38] sm:$0xff]  ;;  %v23_v18 = vld [vmem:[%s1249_s1 + $0x40] sm:$0xff]  ;;  %v24_v19 = vld [vmem:[%s1249_s1 + $0x48] sm:$0xff]  ;;  %860 = vmatprep.mubr.msk.bf16.mxu1 %vm961_vm14, %v959_v9 }
   0x5   :  { %211 = vmatpush1.bf16.msra.mxu0 %v34_v8  ;;  %v37_v17 = vpack.c.bf16 %v22_v16, %v21_v15  ;;  %v38_v20 = vpack.c.bf16 %v24_v19, %v23_v18  ;;  %v25_v21 = vld [vmem:[%s1249_s1 + $0x50] sm:$0xff]  ;;  %v26_v22 = vld [vmem:[%s1249_s1 + $0x58] sm:$0xff]  ;;  %v27_v24 = vld [vmem:[%s1249_s1 + $0x60] sm:$0xff]  ;;  %v1065_v38 = vadd.s32 128, %v1062_v37 }
   0x6   :  { %111 = vperm.xlu1 %919, %v57_v7   ;;  %67 = vperm.xlu0 %918, %v57_v7   ;;  %v39_v23 = vpack.c.bf16 %v26_v22, %v25_v21  ;;  %v28_v25 = vld [vmem:[%s1249_s1 + $0x68] sm:$0xff]  ;;  %v29_v27 = vld [vmem:[%s1249_s1 + $0x70] sm:$0xff]  ;;  %v30_v28 = vld [vmem:[%s1249_s1 + $0x78] sm:$0xff] }
   0x7   :  { %212 = vmatprep.subr.bf16.mxu0 %v958_v1  ;;  %v40_v26 = vpack.c.bf16 %v28_v25, %v27_v24  ;;  %v41_v29 = vpack.c.bf16 %v30_v28, %v29_v27  ;;  %v31_v30 = vld [vmem:[%s1249_s1 + $0x80] sm:$0xff]  ;;  %v32_v31 = vld [vmem:[%s1249_s1 + $0x88] sm:$0xff]  ;;  %v33_v32 = vld [vmem:[%s1249_s1 + $0x90] sm:$0xff] }
   0x8   :  { %v42_v33 = vpack.c.bf16 %v32_v31, %v31_v30  ;;  %v43_v34 = vpack.c.bf16 %v33_v32, %v33_v32  ;;  %v1101_v6 = vld [vmem:[%s1249_s1 + $0x98] ss:$0 sm:$0xff]  ;;  %v45_v19 = vld [vmem:[%s1249_s1 + $0xa0] sm:$0xff] }
   0x9   :  { %213 = vmatpush1.bf16.msra.mxu0 %v35_v10 }
   0xa   :  { %921 = vset.pattern.permute.xlu1 %v960_v14  ;;  %920 = vset.pattern.permute.xlu0 %v960_v14  ;;  %v208_v35 = vsel %vm206_vm0, %v43_v34, 0  ;;  %vm313_vm0 = vcmask 130048  }
   0xb   :  { %155 = vperm.xlu1 %921, %v57_v7   ;;  %152 = vperm.xlu0 %920, %v56_v2  }
   0xc   :  { %214 = vmatprep.subr.bf16.mxu0 %v958_v1 }
   0xd   :  { %215 = vmatpush1.bf16.msra.mxu0 %v36_v13 }
   0xe   :  { %216 = vmatprep.subr.bf16.mxu0 %v958_v1 }
   0xf   :  { %922 = vset.pattern.permute.xlu1 %v958_v1 }
  0x11   :  { %217 = vmatpush1.bf16.msra.mxu0 %v37_v17 }
  0x12   :  { %218 = vmatprep.subr.bf16.mxu0 %v958_v1 }
  0x15   :  { %219 = vmatpush1.bf16.msra.mxu0 %v38_v20  ;;  %v46_v20 = vld [vmem:[%s1249_s1 + $0xa8] sm:$0xff] }
  0x16   :  { %220 = vmatprep.subr.bf16.mxu0 %v958_v1  ;;  %v1112_v21 = vpack.c.bf16 %v46_v20, %v45_v19  ;;  %v53_v20 = vld [vmem:[%s1249_s1 + $0xd8] sm:$0xff] }
  0x19   :  { %221 = vmatpush1.bf16.msra.mxu0 %v39_v23 }
  0x1a   :  { %222 = vmatprep.subr.bf16.mxu0 %v958_v1 }
  0x1d   :  { %223 = vmatpush1.bf16.msra.mxu0 %v40_v26 }
  0x1e   :  { %224 = vmatprep.subr.bf16.mxu0 %v958_v1 }
  0x21   :  { %225 = vmatpush1.bf16.msra.mxu0 %v41_v29 }
  0x22   :  { %226 = vmatprep.subr.bf16.mxu0 %v958_v1 }
  0x25   :  { %227 = vmatpush1.bf16.msra.mxu0 %v42_v33 }
  0x26   :  { %228 = vmatprep.subr.bf16.mxu0 %v958_v1 }
  0x29   :  { %229 = vmatpush1.bf16.msra.mxu0 %v208_v35 }
  0x81   :  { %v109_v39 = vpop.permute.xlu1 %108  ;;  %v65_v40 = vpop.permute.xlu0 %64 }
  0x82   :  { %vm75_vm1 = vcmp.eq.s32.totalorder %v65_v40, %v1062_v37  ;;  %vm76_vm2 = vcmp.eq.s32.totalorder %v65_v40, %v1065_v38  ;;  %vm119_vm3 = vcmp.eq.s32.totalorder %v109_v39, %v1062_v37  ;;  %vm120_vm4 = vcmp.eq.s32.totalorder %v109_v39, %v1065_v38  ;;  %v58_v40 = vld [vmem:[%s1248_s0 + $0x10] sm:$0xff] }
  0x83   :  { %v793_v41 = vsel %vm75_vm1, 1.0, %v959_v9  ;;  %v794_v42 = vsel %vm76_vm2, 1.0, %v959_v9  ;;  %v801_v51 = vsel %vm119_vm3, 1.0, %v959_v9  ;;  %v802_v52 = vsel %vm120_vm4, 1.0, %v959_v9 }
  0x85   :  { %v112_v43 = vpop.permute.xlu1 %111  ;;  %v68_v44 = vpop.permute.xlu0 %67 }
  0x86   :  { %vm121_vm5 = vcmp.eq.s32.totalorder %v112_v43, %v1062_v37  ;;  %vm122_vm6 = vcmp.eq.s32.totalorder %v112_v43, %v1065_v38  ;;  %vm77_vm7 = vcmp.eq.s32.totalorder %v68_v44, %v1062_v37  ;;  %vm78_vm8 = vcmp.eq.s32.totalorder %v68_v44, %v1065_v38 }
  0x87   :  { %v803_v45 = vsel %vm121_vm5, 1.0, %v959_v9  ;;  %v804_v46 = vsel %vm122_vm6, 1.0, %v959_v9  ;;  %v795_v47 = vsel %vm77_vm7, 1.0, %v959_v9  ;;  %v796_v48 = vsel %vm78_vm8, 1.0, %v959_v9 }
  0x88   :  { %v99_v49 = vpack.c.bf16 %v795_v47, %v793_v41  ;;  %v100_v50 = vpack.c.bf16 %v796_v48, %v794_v42  ;;  %v143_v53 = vpack.c.bf16 %v803_v45, %v801_v51  ;;  %v144_v54 = vpack.c.bf16 %v804_v46, %v802_v52  ;;  %v59_v41 = vld [vmem:[%s1248_s0 + $0x18] sm:$0xff] }
  0x8a   :  { %v103_v55 = vadd.bf16 0, %v99_v49  ;;  %v104_v56 = vadd.bf16 0, %v100_v50  ;;  %v156_v57 = vpop.permute.xlu1 %155  ;;  %v153_v58 = vpop.permute.xlu0 %152 }
  0x8b   :  { %vm165_vm9 = vcmp.eq.s32.totalorder %v156_v57, %v1062_v37  ;;  %vm166_vm10 = vcmp.eq.s32.totalorder %v156_v57, %v1065_v38  ;;  %vm163_vm11 = vcmp.eq.s32.totalorder %v153_v58, %v1062_v37  ;;  %vm164_vm12 = vcmp.eq.s32.totalorder %v153_v58, %v1065_v38 }
  0x8c   :  { %v811_v59 = vsel %vm165_vm9, 1.0, %v959_v9  ;;  %v812_v60 = vsel %vm166_vm10, 1.0, %v959_v9  ;;  %v809_v61 = vsel %vm163_vm11, 1.0, %v959_v9  ;;  %v810_v62 = vsel %vm164_vm12, 1.0, %v959_v9 }
  0x8d   :  { %v187_v63 = vpack.c.bf16 %v811_v59, %v809_v61  ;;  %v148_v1 = vadd.bf16 %v144_v54, %v104_v56  ;;  %v188_v2 = vpack.c.bf16 %v812_v60, %v810_v62  ;;  %v147_v3 = vadd.bf16 %v143_v53, %v103_v55 }
  0x8f   :  { %v192_v4 = vadd.bf16 %v188_v2, %v148_v1  ;;  %v191_v5 = vadd.bf16 %v187_v63, %v147_v3 }
  0x91   :  { %818 = vmatprep.mubr.msk.bf16.mxu0 %vm199_vm13, %v192_v4 }
  0x92   :  { %243 = vmatmul.mubr.bf16.vlgmr.msra.gmra.mrb[0].mxu0 %v191_v5 }
 0x165   :  { %v244_v7 = vpop.f32.mrb[0].mxu0 }
 0x166   :  { %v245_v8 = vadd.f32 %v1101_v6, %v244_v7  ;;  %v246_v10 = vpop.f32.mrb[1].mxu0 }
 0x167   :  { %v247_v11 = vpop.f32.mrb[2].mxu0 }
 0x168   :  { %v248_v12 = vadd.f32 %v1101_v6, %v247_v11  ;;  %v249_v13 = vpop.f32.mrb[3].mxu0  ;;  %925 = vtanh.f32 %v245_v8 }
 0x16a   :  { %927 = vtanh.f32 %v248_v12 }
 0x172   :  { %v926_v15 = vpop.eup %925 }
 0x174   :  { %v928_v16 = vpop.eup %927 }
 0x175   :  { %v263_v17 = vpack.c.bf16 %v928_v16, %v926_v15 }
 0x177   :  { %v270_v18 = vsel %vm265_vm15, %v263_v17, 0 }
 0x178   :  { %859 = vmatpush3.bf16.xpose.msra.mxu1 %v270_v18 }
 0x17f   :  { %861 = vmatmul.mubr.msk.bf16.vlgmr.msra.gmra.mrb[0].mxu1 %vm265_vm15, %v1112_v21 }
 0x252   :  { %v306_v22 = vpop.f32.mrb[0].mxu1 }
 0x253   :  { %v862_v23 = vpop.f32.mrb[1].mxu1  ;;  %v314_v24 = vsel %vm313_vm0, %v306_v22, -inf }
 0x254   :  { %315 = vmax.xlane.f32.xlu1 %v314_v24  ;;  %v309_v25 = vpop.f32.mrb[2].mxu1  ;;  %v1180_v24 = vld [vmem:[%s1249_s1 + $0xc8] sm:$0xff] }
 0x255   :  { %v863_v26 = vpop.f32.mrb[3].mxu1  ;;  %v317_v27 = vsel %vm313_vm0, %v309_v25, -inf }
 0x256   :  { %318 = vmax.xlane.f32.xlu0 %v317_v27  ;;  %v1190_v27 = vld [vmem:[%s1249_s1 + $0xb8] sm:$0xff] }
 0x2e1   :  { %v316_v28 = vpop.xlane.xlu1 %315 }
 0x2e2   :  { %v320_v29 = vsub.f32 %v306_v22, %v316_v28  ;;  %v1175_v22 = vld [vmem:[%s1249_s1 + $0xc0] sm:$0xff] }
 0x2e3   :  { %v319_v30 = vpop.xlane.xlu0 %318 }
 0x2e4   :  { %v322_v31 = vmul.f32 1.442695, %v320_v29  ;;  %v321_v32 = vsub.f32 %v309_v25, %v319_v30  ;;  %v1185_v25 = vld [vmem:[%s1249_s1 + $0xb0] sm:$0xff] }
 0x2e6   :  { %929 = vpow2.f32 %v322_v31  ;;  %v324_v33 = vmul.f32 1.442695, %v321_v32 }
 0x2e8   :  { %931 = vpow2.f32 %v324_v33 }
 0x2f0   :  { %v930_v34 = vpop.eup %929 }
 0x2f1   :  { %v326_v35 = vsel %vm313_vm0, %v930_v34, 0.0 }
 0x2f2   :  { %v932_v36 = vpop.eup %931  ;;  %327 = vadd.xlane.f32.xlu0 %v326_v35 }
 0x2f3   :  { %v329_v39 = vsel %vm313_vm0, %v932_v36, 0.0 }
 0x2f4   :  { %330 = vadd.xlane.f32.xlu1 %v329_v39 }
 0x305   :  { %70 = vperm.xlu1 %922, %v58_v40  }
 0x309   :  { %73 = vperm.xlu1 %922, %v59_v41  }
 0x30d   :  { %923 = vset.pattern.permute.xlu1 %v957_v0 }
 0x30e   :  { %114 = vperm.xlu1 %923, %v58_v40  }
 0x312   :  { %117 = vperm.xlu1 %923, %v59_v41  }
 0x316   :  { %924 = vset.pattern.permute.xlu1 %v960_v14 }
 0x317   :  { %158 = vperm.xlu1 %924, %v58_v40  }
 0x31b   :  { %161 = vperm.xlu1 %924, %v59_v41  }
 0x31f   :  { %339 = vxpose.xlu0.c.b16.start.end [1/1] (short) (narrow) %v263_v17, 32 }
 0x37f   :  { %v328_v42 = vpop.xlane.xlu0 %327 }
 0x380   :  { %933 = vrcp.f32 %v328_v42 }
 0x381   :  { %v331_v43 = vpop.xlane.xlu1 %330 }
 0x382   :  { %935 = vrcp.f32 %v331_v43 }
 0x385   :  { %v347_v44 = vpop.trf.xlu0  ;;  %v71_v50 = vpop.permute.xlu1 %70 }
 0x386   :  { %866 = vmatprep.mubr.msk.bf16.mxu1 %vm313_vm0, %v347_v44  ;;  %vm79_vm1 = vcmp.eq.s32.totalorder %v71_v50, %v1062_v37  ;;  %vm80_vm2 = vcmp.eq.s32.totalorder %v71_v50, %v1065_v38 }
 0x387   :  { %v797_v53 = vsel %vm79_vm1, 1.0, %v959_v9  ;;  %v798_v54 = vsel %vm80_vm2, 1.0, %v959_v9 }
 0x389   :  { %v348_v49 = vpop.trf.xlu0  ;;  %v74_v51 = vpop.permute.xlu1 %73 }
 0x38a   :  { %v934_v45 = vpop.eup %933  ;;  %vm81_vm3 = vcmp.eq.s32.totalorder %v74_v51, %v1062_v37  ;;  %vm82_vm4 = vcmp.eq.s32.totalorder %v74_v51, %v1065_v38  ;;  %v962_v51 = vmov 1065369472  }
 0x38b   :  { %v334_v46 = vmul.f32 %v934_v45, %v930_v34  ;;  %v799_v55 = vsel %vm81_vm3, 1.0, %v959_v9  ;;  %v800_v56 = vsel %vm82_vm4, 1.0, %v959_v9 }
 0x38c   :  { %v936_v47 = vpop.eup %935  ;;  %v101_v58 = vpack.c.bf16 %v799_v55, %v797_v53  ;;  %v102_v59 = vpack.c.bf16 %v800_v56, %v798_v54 }
 0x38d   :  { %v335_v48 = vmul.f32 %v936_v47, %v932_v36  ;;  %336 = vst.msk [vmem:[%s1250_s3] sm:$0xff] %vm313_vm0, %v334_v46  ;;  %v115_v52 = vpop.permute.xlu1 %114 }
 0x38e   :  { %vm123_vm5 = vcmp.eq.s32.totalorder %v115_v52, %v1062_v37  ;;  %vm124_vm6 = vcmp.eq.s32.totalorder %v115_v52, %v1065_v38  ;;  %v105_v1 = vadd.bf16 0, %v101_v58  ;;  %v106_v2 = vadd.bf16 0, %v102_v59 }
 0x38f   :  { %337 = vst.msk [vmem:[%s1250_s3 + $0x8] sm:$0xff] %vm313_vm0, %v335_v48  ;;  %v338_v0 = vpack.c.bf16 %v335_v48, %v334_v46  ;;  %v805_v60 = vsel %vm123_vm5, 1.0, %v959_v9  ;;  %v806_v61 = vsel %vm124_vm6, 1.0, %v959_v9 }
 0x391   :  { %910 = vmatprep.subr.msk.bf16.mxu1 %vm313_vm0, %v338_v0  ;;  %v362_v14 = vsel %vm313_vm0, %v338_v0, 0  ;;  %v118_v57 = vpop.permute.xlu1 %117 }
 0x392   :  { %865 = vmatpush3.bf16.xpose.msra.mxu1 %v362_v14  ;;  %vm125_vm7 = vcmp.eq.s32.totalorder %v118_v57, %v1062_v37  ;;  %vm126_vm8 = vcmp.eq.s32.totalorder %v118_v57, %v1065_v38 }
 0x393   :  { %v807_v62 = vsel %vm125_vm7, 1.0, %v959_v9  ;;  %v808_v63 = vsel %vm126_vm8, 1.0, %v959_v9 }
 0x394   :  { %v145_v4 = vpack.c.bf16 %v807_v62, %v805_v60  ;;  %v146_v5 = vpack.c.bf16 %v808_v63, %v806_v61 }
 0x396   :  { %v159_v3 = vpop.permute.xlu1 %158  ;;  %v149_v11 = vadd.bf16 %v145_v4, %v105_v1  ;;  %v150_v12 = vadd.bf16 %v146_v5, %v106_v2 }
 0x397   :  { %vm167_vm9 = vcmp.eq.s32.totalorder %v159_v3, %v1062_v37  ;;  %vm168_vm10 = vcmp.eq.s32.totalorder %v159_v3, %v1065_v38 }
 0x398   :  { %v813_v7 = vsel %vm167_vm9, 1.0, %v959_v9  ;;  %v814_v8 = vsel %vm168_vm10, 1.0, %v959_v9 }
 0x399   :  { %867 = vmatmul.mubr.msk.bf16.vlgmr.msra.gmra.mrb[4].mxu1 %vm313_vm0, %v348_v49 }
 0x39a   :  { %v162_v10 = vpop.permute.xlu1 %161 }
 0x39b   :  { %vm169_vm11 = vcmp.eq.s32.totalorder %v162_v10, %v1062_v37  ;;  %vm170_vm12 = vcmp.eq.s32.totalorder %v162_v10, %v1065_v38  ;;  %v54_v37 = vld [vmem:[%s1249_s1 + $0xe0] sm:$0xff] }
 0x39c   :  { %v815_v13 = vsel %vm169_vm11, 1.0, %v959_v9  ;;  %v816_v15 = vsel %vm170_vm12, 1.0, %v959_v9  ;;  %v55_v38 = vpack.c.bf16 %v54_v37, %v53_v20 }
 0x39d   :  { %v189_v16 = vpack.c.bf16 %v815_v13, %v813_v7  ;;  %v190_v17 = vpack.c.bf16 %v816_v15, %v814_v8 }
 0x39e   :  { %870 = vmatprep.subr.bf16.mxu1 %v55_v38  ;;  %896 = vmatprep.subr.bf16.mxu0 %v55_v38 }
 0x39f   :  { %v194_v18 = vadd.bf16 %v190_v17, %v150_v12  ;;  %v193_v19 = vadd.bf16 %v189_v16, %v149_v11  ;;  %871 = vmatpush3.bf16.msra.mxu1 %v55_v38  ;;  %897 = vmatpush3.bf16.msra.mxu0 %v55_v38 }
 0x3a0   :  { %876 = vmatprep.subr.bf16.mxu1 %v959_v9 }
 0x3a1   :  { %819 = vmatprep.mubr.msk.bf16.mxu0 %vm199_vm13, %v194_v18  ;;  %vm781_vm13 = vcmask 1040384  }
 0x3a2   :  { %251 = vmatmul.mubr.bf16.gmra.mrb[4].mxu0 %v193_v19 }
 0x46c   :  { %v868_v23 = vpop.f32.mrb[4].mxu1 }
 0x46d   :  { %v398_v26 = vpop.f32.mrb[5].mxu1  ;;  %v415_v29 = vmul.f32 %v868_v23, %v1175_v22 }
 0x46e   :  { %v869_v28 = vpop.f32.mrb[6].mxu1  ;;  %v413_v32 = vmul.f32 %v398_v26, %v1185_v25 }
 0x46f   :  { %v416_v30 = vmul.f32 %v869_v28, %v1180_v24  ;;  %v401_v31 = vpop.f32.mrb[7].mxu1 }
 0x470   :  { %v414_v33 = vmul.f32 %v401_v31, %v1190_v27 }
 0x471   :  { %v418_v34 = vpack.c.bf16 %v416_v30, %v415_v29 }
 0x472   :  { %v417_v35 = vpack.c.bf16 %v414_v33, %v413_v32 }
 0x474   :  { %872 = vmatprep.mubr.msk.bf16.mxu1 %vm313_vm0, %v417_v35 }
 0x475   :  { %873 = vmatmul.mubr.msk.bf16.vlgmr.msra.gmra.mrb[8].mxu1 %vm313_vm0, %v418_v34  ;;  %v252_v36 = vpop.f32.mrb[4].mxu0 }
 0x476   :  { %880 = vmatprep.mubr.msk.bf16.mxu1 %vm961_vm14, %v959_v9  ;;  %v254_v39 = vpop.f32.mrb[5].mxu0  ;;  %v253_v42 = vadd.f32 %v1101_v6, %v252_v36 }
 0x477   :  { %v255_v40 = vpop.f32.mrb[6].mxu0 }
 0x478   :  { %v257_v41 = vpop.f32.mrb[7].mxu0  ;;  %v256_v43 = vadd.f32 %v1101_v6, %v255_v40  ;;  %937 = vtanh.f32 %v253_v42 }
 0x47a   :  { %939 = vtanh.f32 %v256_v43 }
 0x482   :  { %v938_v44 = vpop.eup %937 }
 0x484   :  { %v940_v45 = vpop.eup %939 }
 0x485   :  { %v264_v46 = vpack.c.bf16 %v940_v45, %v938_v44 }
 0x487   :  { %v526_v6 = vsel %vm265_vm15, %v264_v46, 0 }
 0x548   :  { %v874_v47 = vpop.f32.mrb[8].mxu1 }
 0x549   :  { %v459_v48 = vpop.f32.mrb[9].mxu1 }
 0x54a   :  { %v875_v0 = vpop.f32.mrb[10].mxu1 }
 0x54b   :  { %v475_v14 = vpack.c.bf16 %v875_v0, %v874_v47  ;;  %v462_v49 = vpop.f32.mrb[11].mxu1 }
 0x54c   :  { %v474_v50 = vpack.c.bf16 %v462_v49, %v459_v48 }
 0x54e   :  { %877 = vmatpush3.bf16.msra.mxu1 %v474_v50 }
 0x54f   :  { %878 = vmatprep.subr.bf16.mxu1 %v959_v9 }
 0x552   :  { %879 = vmatpush3.bf16.msra.mxu1 %v475_v14 }
 0x553   :  { %884 = vmatprep.subr.bf16.mxu1 %v959_v9 }
 0x555   :  { %881 = vmatmul.mubr.msk.bf16.vlgmr.msra.gmra.mrb[12].mxu1 %vm265_vm15, %v962_v51 }
 0x556   :  { %886 = vmatprep.mubr.msk.bf16.mxu1 %vm961_vm14, %v959_v9 }
 0x55b   :  { %885 = vmatpush3.bf16.xpose.msra.mxu1 %v526_v6 }
 0x562   :  { %887 = vmatmul.mubr.msk.bf16.vlgmr.msra.gmra.mrb[16].mxu1 %vm265_vm15, %v1112_v21 }
 0x628   :  { %v1211_v52 = vpop.f32.mrb[12].mxu1 }
 0x629   :  { %v882_v53 = vpop.f32.mrb[13].mxu1 }
 0x62a   :  { %v516_v54 = vpop.f32.mrb[14].mxu1 }
 0x62b   :  { %v883_v55 = vpop.f32.mrb[15].mxu1 }
 0x635   :  { %v562_v56 = vpop.f32.mrb[16].mxu1 }
 0x636   :  { %v888_v57 = vpop.f32.mrb[17].mxu1  ;;  %v569_v58 = vsel %vm313_vm0, %v562_v56, -inf }
 0x637   :  { %570 = vmax.xlane.f32.xlu1 %v569_v58  ;;  %v565_v59 = vpop.f32.mrb[18].mxu1 }
 0x638   :  { %v889_v60 = vpop.f32.mrb[19].mxu1  ;;  %v572_v61 = vsel %vm313_vm0, %v565_v59, -inf }
 0x639   :  { %573 = vmax.xlane.f32.xlu0 %v572_v61 }
 0x6c4   :  { %v571_v62 = vpop.xlane.xlu1 %570 }
 0x6c5   :  { %v575_v63 = vsub.f32 %v562_v56, %v571_v62 }
 0x6c6   :  { %v574_v1 = vpop.xlane.xlu0 %573 }
 0x6c7   :  { %v577_v2 = vmul.f32 1.442695, %v575_v63  ;;  %v576_v21 = vsub.f32 %v565_v59, %v574_v1 }
 0x6c9   :  { %941 = vpow2.f32 %v577_v2  ;;  %v579_v3 = vmul.f32 1.442695, %v576_v21 }
 0x6cb   :  { %943 = vpow2.f32 %v579_v3 }
 0x6d3   :  { %v942_v4 = vpop.eup %941 }
 0x6d4   :  { %v581_v5 = vsel %vm313_vm0, %v942_v4, 0.0 }
 0x6d5   :  { %v944_v7 = vpop.eup %943  ;;  %582 = vadd.xlane.f32.xlu0 %v581_v5 }
 0x6d6   :  { %v584_v8 = vsel %vm313_vm0, %v944_v7, 0.0 }
 0x6d9   :  { %585 = vadd.xlane.f32.xlu0 %v584_v8 }
 0x706   :  { %595 = vxpose.xlu0.c.b16.start.end [1/1] (short) (narrow) %v264_v46, 32 }
 0x762   :  { %v583_v10 = vpop.xlane.xlu0 %582 }
 0x763   :  { %945 = vrcp.f32 %v583_v10 }
 0x766   :  { %v586_v11 = vpop.xlane.xlu0 %585 }
 0x767   :  { %947 = vrcp.f32 %v586_v11 }
 0x76c   :  { %v603_v12 = vpop.trf.xlu0 }
 0x76d   :  { %v946_v13 = vpop.eup %945  ;;  %892 = vmatprep.mubr.msk.bf16.mxu1 %vm313_vm0, %v603_v12 }
 0x76e   :  { %v589_v15 = vmul.f32 %v946_v13, %v942_v4 }
 0x770   :  { %828 = vst.msk [vmem:[%s1250_s3 + $0x10] sm:$0xff] %vm313_vm0, %v589_v15  ;;  %v604_v20 = vpop.trf.xlu0 }
 0x771   :  { %v948_v16 = vpop.eup %947 }
 0x772   :  { %v590_v17 = vmul.f32 %v948_v16, %v944_v7 }
 0x774   :  { %829 = vst.msk [vmem:[%s1250_s3 + $0x18] sm:$0xff] %vm313_vm0, %v590_v17  ;;  %v594_v18 = vpack.c.bf16 %v590_v17, %v589_v15 }
 0x776   :  { %911 = vmatprep.subr.msk.bf16.mxu1 %vm313_vm0, %v594_v18  ;;  %v618_v19 = vsel %vm313_vm0, %v594_v18, 0 }
 0x777   :  { %891 = vmatpush3.bf16.xpose.msra.mxu1 %v618_v19 }
 0x778   :  { %902 = vmatprep.subr.bf16.mxu1 %v959_v9 }
 0x77e   :  { %893 = vmatmul.mubr.msk.bf16.vlgmr.msra.gmra.mrb[20].mxu1 %vm313_vm0, %v604_v20 }
 0x77f   :  { %906 = vmatprep.mubr.msk.bf16.mxu1 %vm961_vm14, %v959_v9  ;;  %vm783_vm14 = vcmask 58368  }
 0x851   :  { %v894_v37 = vpop.f32.mrb[20].mxu1 }
 0x852   :  { %v654_v38 = vpop.f32.mrb[21].mxu1  ;;  %v671_v26 = vmul.f32 %v894_v37, %v1175_v22  ;;  %v52_v22 = vld [vmem:[%s1249_s1 + $0xd0] sm:$0x1] }
 0x853   :  { %v895_v23 = vpop.f32.mrb[22].mxu1  ;;  %v669_v30 = vmul.f32 %v654_v38, %v1185_v25 }
 0x854   :  { %v672_v28 = vmul.f32 %v895_v23, %v1180_v24  ;;  %v657_v29 = vpop.f32.mrb[23].mxu1  ;;  %v514_v24 = vadd.f32 %v1211_v52, %v52_v22 }
 0x855   :  { %v670_v31 = vmul.f32 %v657_v29, %v1190_v27 }
 0x856   :  { %v674_v32 = vpack.c.bf16 %v672_v28, %v671_v26  ;;  %v826_v25 = vmul.f32 -1.442695, %v514_v24 }
 0x857   :  { %v673_v33 = vpack.c.bf16 %v670_v31, %v669_v30 }
 0x858   :  { %949 = vpow2.f32 %v826_v25 }
 0x859   :  { %898 = vmatprep.mubr.msk.bf16.mxu0 %vm313_vm0, %v673_v33 }
 0x85a   :  { %899 = vmatmul.mubr.msk.bf16.vlgmr.msra.gmra.mrb[8].mxu0 %vm313_vm0, %v674_v32 }
 0x92d   :  { %v900_v34 = vpop.f32.mrb[8].mxu0 }
 0x92e   :  { %v715_v35 = vpop.f32.mrb[9].mxu0 }
 0x92f   :  { %v901_v36 = vpop.f32.mrb[10].mxu0 }
 0x930   :  { %v731_v39 = vpack.c.bf16 %v901_v36, %v900_v34  ;;  %v718_v40 = vpop.f32.mrb[11].mxu0 }
 0x931   :  { %v730_v41 = vpack.c.bf16 %v718_v40, %v715_v35 }
 0x933   :  { %903 = vmatpush3.bf16.msra.mxu1 %v730_v41 }
 0x934   :  { %904 = vmatprep.subr.bf16.mxu1 %v959_v9  ;;  %v950_v9 = vpop.eup %949 }
 0x935   :  { %v522_v48 = vadd.f32 1.0, %v950_v9 }
 0x937   :  { %905 = vmatpush3.bf16.msra.mxu1 %v731_v39 }
 0x93a   :  { %907 = vmatmul.mubr.msk.bf16.vlgmr.msra.gmra.mrb[24].mxu1 %vm265_vm15, %v962_v51 }
 0xa0d   :  { %v766_v27 = vpop.f32.mrb[24].mxu1 }
 0xa0e   :  { %v767_v42 = vadd.f32 %v766_v27, %v52_v22  ;;  %v908_v43 = vpop.f32.mrb[25].mxu1 }
 0xa0f   :  { %v769_v44 = vpop.f32.mrb[26].mxu1 }
 0xa10   :  { %v835_v45 = vmul.f32 -1.442695, %v767_v42  ;;  %v909_v46 = vpop.f32.mrb[27].mxu1 }
 0xa12   :  { %951 = vpow2.f32 %v835_v45 }
 0xa1c   :  { %v952_v47 = vpop.eup %951 }
 0xa1d   :  { %v775_v0 = vadd.f32 1.0, %v952_v47 }
 0xa1f   :  { %953 = vrcp.f32 %v775_v0 }
 0xa20   :  { %955 = vrcp.f32 %v522_v48 }
 0xa29   :  { %v954_v14 = vpop.eup %953 }
 0xa2a   :  { %v779_v49 = vrot.slane %v954_v14, 7  ;;  %v956_v50 = vpop.eup %955 }
 0xa2c   :  { %v782_v51 = vsel %vm781_vm13, %v956_v50, %v779_v49 }
 0xa2d   :  { %784 = vst.msk [vmem:[%s1251_s2] sm:$0x3] %vm783_vm14, %v782_v51 }

</bundles_post_ra>
